<compile_context>
chip_gen: v6e
topology: v6e:2x2x1
jax: 0.10.0
libtpu: 0.0.40
codegen_flags: <defaults>
</compile_context>

<pallas_src>
import jax
import jax.numpy as jnp
from jax.experimental import pallas as pl
from jax.experimental.pallas import tpu as pltpu

_LANE = 128
_NEG_BIG = -1e30  # large-but-finite "-inf": avoids inf-inf -> NaN in online updates


def _round_up(x, m):
    return ((x + m - 1) // m) * m


def _sublane_multiple(dtype):
    # rows per packed sublane tile: 8 for f32, 16 for bf16, 32 for int8/fp8
    itemsize = jnp.dtype(dtype).itemsize
    return 8 * max(1, 4 // itemsize)


def _vmem_capacity_bytes():
    try:
        cap = getattr(pltpu.get_tpu_info(), "vmem_capacity_bytes", None)
        if cap:
            return int(cap)
    except Exception:
        pass
    return 64 * 1024 * 1024  # conservative default (v7x per-core VMEM)


def _step_vmem_bytes(bb, bs, H, s_pad, itemsize):
    """Per-grid-step VMEM footprint estimate (bytes), incl. hidden temporaries."""
    lane_h = _round_up(H, _LANE)          # lane padding when H < 128
    lane_s = _round_up(s_pad, _LANE)
    x_tile = bb * bs * lane_h * itemsize              # one x buffer
    tmp_f32 = 2 * bb * bs * lane_h * 4                # x*w and p*x products (f32 even for bf16 on v5e)
    ctx_out = bb * lane_h * itemsize
    wts_out = bb * lane_s * itemsize
    scratch = bb * lane_s * 4 + bb * lane_h * 4 + 2 * bb * _LANE * 4
    return 2 * x_tile + tmp_f32 + 2 * (ctx_out + wts_out) + scratch


def _choose_tiling(B, S, H, dtype):
    itemsize = jnp.dtype(dtype).itemsize
    sub = _sublane_multiple(dtype)
    cap = _vmem_capacity_bytes()
    budget = cap // 2          # leave headroom for compiler-internal scratch

    bb_min = B if B <= sub else sub

    # -- sequence blocking: keep the whole sequence per step when it fits -----
    if _step_vmem_bytes(bb_min, S, H, S, itemsize) <= budget:
        bs = S
    else:
        bs = _LANE
        for cand in (8192, 4096, 2048, 1024, 512, 256, 128):
            if cand <= _round_up(S, _LANE) and _step_vmem_bytes(
                    bb_min, cand, H, _round_up(S, cand), itemsize) <= budget:
                bs = cand
                break
    s_pad = _round_up(S, bs)

    # -- batch blocking: as large as the budget allows, sublane-packed --------
    bb = bb_min
    if B > sub:
        b_ceil = _round_up(B, sub)
        # keep >= 2 batch grid steps when the batch is splittable: lets the
        # "parallel" axis use both v7x TensorCores and keeps pipelining going
        bb_cap = b_ceil if b_ceil < 2 * sub else max(sub, (b_ceil // 2) // sub * sub)
        bb_cap = min(bb_cap, 1024)
        per_b = _step_vmem_bytes(1, bs, H, s_pad, itemsize)
        bb = max(sub, min(bb_cap, (budget // max(per_b, 1)) // sub * sub))
        # even out the blocks to minimize batch padding
        n_b = -(-B // bb)
        bb = max(sub, _round_up(-(-B // n_b), sub))
    b_pad = _round_up(B, bb)

    need = _step_vmem_bytes(bb, bs, H, s_pad, itemsize)
    vmem_limit = int(min(cap - (2 << 20), max(need + need // 2 + (2 << 20), 32 << 20)))
    return bb, bs, b_pad, s_pad, vmem_limit


def _make_attention_kernel(seq_len, block_s, num_s_blocks, need_mask):
    """Kernel body builder.  Static python branch: single-S-block fast path vs.
    online-softmax accumulation over S tiles."""

    def _scores(x, w, j):
        # Linear(H -> 1) without a degenerate MXU matmul: VPU multiply + lane
        # (H) reduce in f32.  keepdims layout: the later broadcast back against
        # the (bb, bs, H) tile needs no relayout.
        s = jnp.sum(x * w[None, :, :], axis=-1, keepdims=True,
                    dtype=jnp.float32)                               # (bb, bs, 1)
        if need_mask:
            pos = j * block_s + jax.lax.broadcasted_iota(jnp.int32, s.shape, 1)
            s = jnp.where(pos < seq_len, s, _NEG_BIG)
        return s

    if num_s_blocks == 1:
        def kernel(x_ref, w_ref, ctx_ref, wts_ref):
            x = x_ref[...]                                           # (bb, S, H)
            w = w_ref[...]                                           # (1, H)
            s = _scores(x, w, 0)                                     # (bb, S, 1)
            m = jnp.max(s, axis=1, keepdims=True)                    # (bb, 1, 1)
            e = jnp.exp(s - m)                                       # (bb, S, 1)
            l = jnp.sum(e, axis=1, keepdims=True)                    # (bb, 1, 1)
            inv = pl.reciprocal(l, approx=False)                     # exact
            wts = e * inv                                            # (bb, S, 1)
            ctx = jnp.sum(wts.astype(x.dtype) * x, axis=1,
                          dtype=jnp.float32)                         # (bb, H)
            ctx_ref[...] = ctx.astype(ctx_ref.dtype)
            wts_ref[...] = wts[:, :, 0].astype(wts_ref.dtype)        # lane-dense (bb, S)
        return kernel

    def kernel(x_ref, w_ref, ctx_ref, wts_ref, scores_scr, m_scr, l_scr, acc_scr):
        j = pl.program_id(1)

        @pl.when(j == 0)
        def _():
            m_scr[...] = jnp.full_like(m_scr, _NEG_BIG)
            l_scr[...] = jnp.zeros_like(l_scr)
            acc_scr[...] = jnp.zeros_like(acc_scr)

        x = x_ref[...]                                               # (bb, bs, H)
        w = w_ref[...]                                               # (1, H)
        s = _scores(x, w, j)                                         # (bb, bs, 1)

        # Online-softmax update (flash-style), f32 running statistics.
        m_old = m_scr[...]                                           # (bb, 1)
        m_new = jnp.maximum(m_old, jnp.max(s, axis=1))               # (bb, 1)
        alpha = jnp.exp(m_old - m_new)                               # (bb, 1)
        e = jnp.exp(s - m_new[:, :, None])                           # (bb, bs, 1)
        l_scr[...] = alpha * l_scr[...] + jnp.sum(e, axis=1)         # (bb, 1)
        acc_scr[...] = alpha * acc_scr[...] + jnp.sum(
            e.astype(x.dtype) * x, axis=1, dtype=jnp.float32)        # (bb, H)
        m_scr[...] = m_new

        # Stash this tile's raw scores (lane-major, 128-aligned offset) so the
        # exact normalized weights can be emitted at the last step.
        off = pl.multiple_of(j * block_s, block_s)
        scores_scr[:, pl.ds(off, block_s)] = s[:, :, 0]

        @pl.when(j == pl.num_programs(1) - 1)
        def _():
            inv = pl.reciprocal(l_scr[...], approx=False)            # (bb, 1)
            ctx_ref[...] = (acc_scr[...] * inv).astype(ctx_ref.dtype)
            wts = jnp.exp(scores_scr[...] - m_scr[...]) * inv        # (bb, S_pad)
            wts_ref[...] = wts.astype(wts_ref.dtype)

    return kernel


def attention_forward(lstm_output, weight, bias, *, block_b=None, block_s=None):
    """
    Args:
      lstm_output: (B, S, H) LSTM output (float32 or bfloat16)
      weight:      (1, H)    nn.Linear(hidden_dim, 1).weight
      bias:        (1,)      nn.Linear(hidden_dim, 1).bias (inert under softmax)
    Returns:
      context: (B, H)
      weights: (B, S, 1)
    """
    del bias  # softmax over the sequence axis is shift-invariant -> bias is inert
    B, S, H = lstm_output.shape
    dtype = lstm_output.dtype
    w = jnp.asarray(weight, dtype=dtype).reshape(1, H)   # lane-dense (1, H)

    bb, bs, b_pad, s_pad, vmem_limit = _choose_tiling(B, S, H, dtype)
    if block_b is not None:
        bb = block_b
        b_pad = _round_up(B, bb)
    if block_s is not None:
        bs = block_s
        s_pad = _round_up(S, bs)
    n_b, n_s = b_pad // bb, s_pad // bs
    need_mask = s_pad != S

    x = lstm_output
    if b_pad != B or s_pad != S:
        x = jnp.pad(x, ((0, b_pad - B), (0, s_pad - S), (0, 0)))

    itemsize = jnp.dtype(dtype).itemsize
    cost = pl.CostEstimate(
        flops=4 * b_pad * s_pad * H + 8 * b_pad * s_pad,
        transcendentals=(1 if n_s == 1 else 2) * b_pad * s_pad,
        bytes_accessed=(b_pad * s_pad * H + H + b_pad * H + b_pad * s_pad) * itemsize,
    )

    kernel = _make_attention_kernel(S, bs, n_s, need_mask)
    scratch_shapes = []
    if n_s > 1:
        scratch_shapes = [
            pltpu.VMEM((bb, s_pad), jnp.float32),   # raw scores (full sequence)
            pltpu.VMEM((bb, 1), jnp.float32),       # running max
            pltpu.VMEM((bb, 1), jnp.float32),       # running denominator
            pltpu.VMEM((bb, H), jnp.float32),       # running context accumulator
        ]

    # TODO(synk): for n_s >> 1, pipeline_mode=pl.Buffered(3) on the x spec and a
    # wrapper-side (B*S, H) repack for very small H are further conditional wins.
    ctx, wts = pl.pallas_call(
        kernel,
        out_shape=(
            jax.ShapeDtypeStruct((b_pad, H), dtype),      # context (lane-dense)
            jax.ShapeDtypeStruct((b_pad, s_pad), dtype),  # weights (lane-dense)
        ),
        grid_spec=pltpu.PrefetchScalarGridSpec(
            num_scalar_prefetch=0,
            grid=(n_b, n_s),
            in_specs=[
                pl.BlockSpec((bb, bs, H), lambda i, j: (i, j, 0)),
                pl.BlockSpec((1, H), lambda i, j: (0, 0)),
            ],
            out_specs=(
                pl.BlockSpec((bb, H), lambda i, j: (i, 0)),
                pl.BlockSpec((bb, s_pad), lambda i, j: (i, 0)),
            ),
            scratch_shapes=scratch_shapes,
        ),
        compiler_params=pltpu.CompilerParams(
            dimension_semantics=("parallel", "arbitrary"),
            vmem_limit_bytes=vmem_limit),
        cost_estimate=cost,
    )(x, w)

    context = ctx[:B]                        # (B, H)
    weights = wts[:B, :S][..., None]         # (B, S, 1), matches PyTorch layout
    return context, weights


def _reference(lstm_output, weight, bias):
    # Pure-JAX reference mirroring the PyTorch forward (with bias).
    scores = jnp.einsum("bsh,oh->bso", lstm_output, weight) + bias   # (B, S, 1)
    weights = jax.nn.softmax(scores, axis=1)                         # (B, S, 1)
    context = jnp.sum(weights * lstm_output, axis=1)                 # (B, H)
    return context, weights


if __name__ == "__main__":
    B, S, H = 2, 8, 32

    key = jax.random.PRNGKey(0)
    kx, kw, kb = jax.random.split(key, 3)

    lstm_output = jax.random.normal(kx, (B, S, H), dtype=jnp.float32)
    bound = 1.0 / (H ** 0.5)
    weight = jax.random.uniform(kw, (1, H), minval=-bound, maxval=bound,
                                dtype=jnp.float32)
    bias = jax.random.uniform(kb, (1,), minval=-bound, maxval=bound,
                              dtype=jnp.float32)

    context, weights = attention_forward(lstm_output, weight, bias)
    jax.block_until_ready((context, weights))

    ctx_ref, wts_ref = _reference(lstm_output, weight, bias)
    assert context.shape == (B, H)
    assert weights.shape == (B, S, 1)
    assert jnp.allclose(context, ctx_ref, atol=1e-5, rtol=1e-5)
    assert jnp.allclose(weights, wts_ref, atol=1e-5, rtol=1e-5)

    print("KERNEL_OK")
</pallas_src>

<mosaic_0001>
module attributes {stable_mosaic.version = 11 : i64} {
  func.func @kernel(%arg0: i32, %arg1: i32, %arg2: memref<2x8x32xf32, #tpu.memory_space<vmem>>, %arg3: memref<1x32xf32, #tpu.memory_space<vmem>>, %arg4: memref<2x32xf32, #tpu.memory_space<vmem>>, %arg5: memref<2x8xf32, #tpu.memory_space<vmem>>) attributes {dimension_semantics = [#tpu.dimension_semantics<parallel>, #tpu.dimension_semantics<arbitrary>], iteration_bounds = array<i64: 1, 1>, scalar_prefetch = 0 : i64, scratch_operands = 0 : i64, tpu.core_type = #tpu.core_type<tc>, window_params = [{transform_indices = @transform_0, window_bounds = array<i64: 2, 8, 32>}, {pipeline_mode = #tpu.pipeline_mode<synchronous>, transform_indices = @transform_1, window_bounds = array<i64: 1, 32>}, {transform_indices = @transform_2, window_bounds = array<i64: 2, 32>}, {transform_indices = @transform_3, window_bounds = array<i64: 2, 8>}]} {
    %c0 = arith.constant 0 : index
    %c0_0 = arith.constant 0 : index
    %c0_1 = arith.constant 0 : index
    %0 = vector.load %arg2[%c0, %c0_0, %c0_1] : memref<2x8x32xf32, #tpu.memory_space<vmem>>, vector<2x8x32xf32>
    %c0_2 = arith.constant 0 : index
    %c0_3 = arith.constant 0 : index
    %1 = vector.load %arg3[%c0_2, %c0_3] : memref<1x32xf32, #tpu.memory_space<vmem>>, vector<1x32xf32>
    %2 = vector.shape_cast %1 : vector<1x32xf32> to vector<1x1x32xf32>
    %3 = vector.broadcast %2 : vector<1x1x32xf32> to vector<2x8x32xf32>
    %4 = arith.mulf %0, %3 : vector<2x8x32xf32>
    %cst = arith.constant dense<0.000000e+00> : vector<2x8xf32>
    %5 = vector.multi_reduction <add>, %4, %cst [2] : vector<2x8x32xf32> to vector<2x8xf32>
    %6 = vector.shape_cast %5 : vector<2x8xf32> to vector<2x8x1xf32>
    %cst_4 = arith.constant dense<0xFF800000> : vector<2x1xf32>
    %7 = vector.multi_reduction <maximumf>, %6, %cst_4 [1] : vector<2x8x1xf32> to vector<2x1xf32>
    %8 = vector.shape_cast %7 : vector<2x1xf32> to vector<2x1x1xf32>
    %9 = vector.broadcast %8 : vector<2x1x1xf32> to vector<2x8x1xf32>
    %10 = arith.subf %6, %9 : vector<2x8x1xf32>
    %11 = math.exp %10 : vector<2x8x1xf32>
    %cst_5 = arith.constant dense<0.000000e+00> : vector<2x1xf32>
    %12 = vector.multi_reduction <add>, %11, %cst_5 [1] : vector<2x8x1xf32> to vector<2x1xf32>
    %13 = vector.shape_cast %12 : vector<2x1xf32> to vector<2x1x1xf32>
    %14 = tpu.reciprocal %13 : vector<2x1x1xf32> -> vector<2x1x1xf32>
    %15 = vector.broadcast %14 : vector<2x1x1xf32> to vector<2x8x1xf32>
    %16 = arith.mulf %11, %15 : vector<2x8x1xf32>
    %17 = vector.broadcast %16 : vector<2x8x1xf32> to vector<2x8x32xf32>
    %18 = arith.mulf %17, %0 : vector<2x8x32xf32>
    %cst_6 = arith.constant dense<0.000000e+00> : vector<2x32xf32>
    %19 = vector.multi_reduction <add>, %18, %cst_6 [1] : vector<2x8x32xf32> to vector<2x32xf32>
    %c0_7 = arith.constant 0 : index
    %c0_8 = arith.constant 0 : index
    %20 = vector.load %arg4[%c0_7, %c0_8] : memref<2x32xf32, #tpu.memory_space<vmem>>, vector<2x32xf32>
    tpu.vector_store %arg4[%c0_7, %c0_8], %19 {strides = array<i32>} : memref<2x32xf32, #tpu.memory_space<vmem>>, vector<2x32xf32>,
    %21 = vector.shape_cast %16 : vector<2x8x1xf32> to vector<2x8xf32>
    %c0_9 = arith.constant 0 : index
    %c0_10 = arith.constant 0 : index
    %22 = vector.load %arg5[%c0_9, %c0_10] : memref<2x8xf32, #tpu.memory_space<vmem>>, vector<2x8xf32>
    tpu.vector_store %arg5[%c0_9, %c0_10], %21 {strides = array<i32>} : memref<2x8xf32, #tpu.memory_space<vmem>>, vector<2x8xf32>,
    return
  }
  func.func @transform_0(%arg0: i32, %arg1: i32) -> (i32, i32, i32) {
    %c0_i32 = arith.constant 0 : i32
    %c0_i32_0 = arith.constant 0 : i32
    return %arg0, %arg1, %c0_i32 : i32, i32, i32
  }
  func.func @transform_1(%arg0: i32, %arg1: i32) -> (i32, i32) {
    %c0_i32 = arith.constant 0 : i32
    %c0_i32_0 = arith.constant 0 : i32
    %c0_i32_1 = arith.constant 0 : i32
    return %c0_i32, %c0_i32_0 : i32, i32
  }
  func.func @transform_2(%arg0: i32, %arg1: i32) -> (i32, i32) {
    %c0_i32 = arith.constant 0 : i32
    %c0_i32_0 = arith.constant 0 : i32
    return %arg0, %c0_i32 : i32, i32
  }
  func.func @transform_3(%arg0: i32, %arg1: i32) -> (i32, i32) {
    %c0_i32 = arith.constant 0 : i32
    %c0_i32_0 = arith.constant 0 : i32
    return %arg0, %c0_i32 : i32, i32
  }
}

</mosaic_0001>

<bundles_post_ra>
// kernel: tpu_custom_call.1
= control target key start
LH: loop header
LB: loop body
LE: loop exit
PB: predicated region body
PF: predicated region fallthrough
CT: control target
= control target key end

     0   :  { %9 = vsyncpa [#allocation3], 0  ;;  %s272_s0 = inlined_call_operand.hbm [shape: f32[2,8,32], index: 0, kind: input, shape index: {}]   ;;  %s273_s1 = inlined_call_operand.vmem [shape: f32[1,32], index: 1, kind: input, shape index: {}]   ;;  %s274_s2 = inlined_call_operand.hbm [shape: f32[2,32], index: 2, kind: output, shape index: {0}]   ;;  %s275_s3 = inlined_call_operand.hbm [shape: f32[2,8], index: 3, kind: output, shape index: {1}]  }
   0x1   :  { %10 = vsyncpa [#allocation4], 0 }
   0x2   :  { %11 = vsyncpa [#allocation7], 0  ;;  %s229_s12 = smov [#allocation2]  }
   0x3   :  { %s17_s13 = sshll.u32 %s229_s12, 4  ;;  %s18_s13 = int_to_ptr.vmem [resolvable:$true] %s17_s13 }
   0x4   :  { %s171_s14 = scalar_lea.vmem %s18_s13, 256  ;;  %p176_p1 = scmp.lt.s32.totalorder %s18_s13, %s18_s13 }
   0x5   :  { %p172_p0 = scmp.ne.s32.totalorder %s18_s13, %s171_s14  ;;  %p177_p2 = scmp.lt.s32.totalorder %s171_s14, %s171_s14 }
   0x7   :  { %p178_p3 = por %p177_p2, %p176_p1 }
   0x9   :  { %p179_p4 = pnand %p178_p3, %p172_p0 }
   0xb   :  { %182 = shalt.err (!%p179_p4)
}
   0xc   :  { %s230_s15 = smov 128   ;;  %s231_s16 = smov 8  }
   0xd   :  { %23 = dma.hbm_to_vmem [thread:$0]  %s272_s0, 256, %s18_s13, [#allocation3], %s230_s15, %s230_s15, %s231_s16  }
   0xe   :  { %223 = dma.done.wait [#allocation3], 256  }
   0xf   :  { %224 = vsyncadd [#allocation3], 4294967040  ;;  %v29_v0 = vld [vmem:[#allocation2] sm:$0xff]  ;;  %vm40_vm0 = vcmask 261120   ;;  %v30_v2 = vld [vmem:[#allocation2 + $0x8] sm:$0xff]  ;;  %v106_v39 = vlaneseq  ;;  %s232_s0 = smov [#allocation6]  }
  0x10   :  { %v149_v1 = vld [vmem:[%s273_s1] ss:$0 sm:$0xff]  ;;  %s136_s1 = sshll.u32 %s232_s0, 4  ;;  %vm99_vm1 = vcmask 1041409   ;;  %vm118_vm2 = vcmask 58368   ;;  %s137_s1 = int_to_ptr.vmem [resolvable:$true] %s136_s1 }
  0x11   :  { %v38_v3 = vmul.f32 %v149_v1, %v29_v0  ;;  %v39_v4 = vmul.f32 %v149_v1, %v30_v2  ;;  %v107_v40 = vand.u32 127, %v106_v39  ;;  %v109_v41 = vshrl.u32 %v106_v39, 7  ;;  %s183_s21 = scalar_lea.vmem %s137_s1, 32  ;;  %p188_p6 = scmp.lt.s32.totalorder %s137_s1, %s137_s1 }
  0x12   :  { %p184_p5 = scmp.ne.s32.totalorder %s137_s1, %s183_s21  ;;  %p189_p7 = scmp.lt.s32.totalorder %s183_s21, %s183_s21 }
  0x13   :  { %v41_v5 = vsel %vm40_vm0, %v38_v3, 0.0  ;;  %v44_v6 = vsel %vm40_vm0, %v39_v4, 0.0  ;;  %v110_v45 = vsub.s32 %v107_v40, %v109_v41 }
  0x14   :  { %42 = vadd.xlane.f32.xlu0 %v41_v5  ;;  %p190_p8 = por %p189_p7, %p188_p6 }
  0x16   :  { %p191_p9 = pnand %p190_p8, %p184_p5 }
  0x18   :  { %45 = vadd.xlane.f32.xlu0 %v44_v6 }
  0x9d   :  { %v43_v7 = vpop.xlane.xlu0 %42 }
  0x9e   :  { %v47_v8 = vrot.slane %v43_v7, 4 }
  0xa0   :  { %v48_v9 = vmax.f32 %v43_v7, %v47_v8 }
  0xa1   :  { %v46_v10 = vpop.xlane.xlu0 %45 }
  0xa2   :  { %v49_v11 = vrot.slane %v48_v9, 2  ;;  %v53_v12 = vrot.slane %v46_v10, 4 }
  0xa4   :  { %v50_v13 = vmax.f32 %v48_v9, %v49_v11  ;;  %v54_v14 = vmax.f32 %v46_v10, %v53_v12 }
  0xa6   :  { %v51_v15 = vrot.slane %v50_v13, 1  ;;  %v55_v16 = vrot.slane %v54_v14, 2 }
  0xa8   :  { %v52_v17 = vmax.f32 %v50_v13, %v51_v15  ;;  %v56_v18 = vmax.f32 %v54_v14, %v55_v16 }
  0xaa   :  { %v59_v19 = vsub.f32 %v43_v7, %v52_v17  ;;  %v57_v20 = vrot.slane %v56_v18, 1 }
  0xac   :  { %v61_v21 = vmul.f32 1.442695, %v59_v19  ;;  %v58_v22 = vmax.f32 %v56_v18, %v57_v20 }
  0xae   :  { %155 = vpow2.f32 %v61_v21  ;;  %v60_v23 = vsub.f32 %v46_v10, %v58_v22 }
  0xb0   :  { %v63_v24 = vmul.f32 1.442695, %v60_v23 }
  0xb2   :  { %157 = vpow2.f32 %v63_v24 }
  0xbb   :  { %v156_v25 = vpop.eup %155 }
  0xbc   :  { %v65_v26 = vrot.slane %v156_v25, 4 }
  0xbe   :  { %v66_v27 = vadd.f32 %v156_v25, %v65_v26 }
  0xbf   :  { %v158_v28 = vpop.eup %157 }
  0xc0   :  { %v71_v29 = vrot.slane %v158_v28, 4  ;;  %v67_v30 = vrot.slane %v66_v27, 2 }
  0xc2   :  { %v72_v31 = vadd.f32 %v158_v28, %v71_v29  ;;  %v68_v32 = vadd.f32 %v67_v30, %v66_v27 }
  0xc4   :  { %v69_v33 = vrot.slane %v68_v32, 1  ;;  %v73_v34 = vrot.slane %v72_v31, 2 }
  0xc6   :  { %v70_v35 = vadd.f32 %v69_v33, %v68_v32  ;;  %v74_v36 = vadd.f32 %v73_v34, %v72_v31 }
  0xc8   :  { %v75_v37 = vrot.slane %v74_v36, 1  ;;  %159 = vrcp.f32 %v70_v35 }
  0xca   :  { %v76_v38 = vadd.f32 %v75_v37, %v74_v36 }
  0xcc   :  { %161 = vrcp.f32 %v76_v38 }
  0xd5   :  { %v160_v42 = vpop.eup %159 }
  0xd6   :  { %v79_v43 = vmul.f32 %v160_v42, %v156_v25 }
  0xd8   :  { %v81_v44 = vmul.f32 %v79_v43, %v29_v0  ;;  %v111_v51 = vrot.slane %v79_v43, %v110_v45 }
  0xd9   :  { %v162_v46 = vpop.eup %161 }
  0xda   :  { %v80_v47 = vmul.f32 %v162_v46, %v158_v28  ;;  %v83_v48 = vsel %vm40_vm0, %v81_v44, 0.0 }
  0xdb   :  { %v84_v49 = vrot.slane %v83_v48, 4 }
  0xdc   :  { %v82_v50 = vmul.f32 %v80_v47, %v30_v2  ;;  %v115_v52 = vrot.slane %v80_v47, %v110_v45 }
  0xdd   :  { %v85_v53 = vadd.f32 %v84_v49, %v83_v48 }
  0xde   :  { %v90_v54 = vsel %vm40_vm0, %v82_v50, 0.0  ;;  %v116_v55 = vsel %vm99_vm1, %v115_v52, %v111_v51 }
  0xdf   :  { %v86_v56 = vrot.slane %v85_v53, 2  ;;  %v91_v57 = vrot.slane %v90_v54, 4  ;;  %119 = vst.msk [vmem:[#allocation6] sm:$0x3] %vm118_vm2, %v116_v55 }
  0xe0   :  { %194 = shalt.err (!%p191_p9)
}
  0xe1   :  { %139 = dma.vmem_to_hbm [thread:$0]  %s137_s1, 32, %s275_s3, [#allocation7]   ;;  %v87_v58 = vadd.f32 %v86_v56, %v85_v53  ;;  %v92_v59 = vadd.f32 %v91_v57, %v90_v54  ;;  %vm102_vm3 = vcmask 254976  }
  0xe2   :  { %s233_s24 = smov [#allocation5]  }
  0xe3   :  { %v93_v60 = vrot.slane %v92_v59, 2  ;;  %v88_v61 = vrot.slane %v87_v58, 1  ;;  %s126_s25 = sshll.u32 %s233_s24, 4  ;;  %s127_s25 = int_to_ptr.vmem [resolvable:$true] %s126_s25 }
  0xe4   :  { %s203_s26 = scalar_lea.vmem %s127_s25, 32  ;;  %p208_p11 = scmp.lt.s32.totalorder %s127_s25, %s127_s25 }
  0xe5   :  { %v94_v62 = vadd.f32 %v93_v60, %v92_v59  ;;  %v89_v0 = vadd.f32 %v88_v61, %v87_v58  ;;  %p204_p10 = scmp.ne.s32.totalorder %s127_s25, %s203_s26  ;;  %p209_p12 = scmp.lt.s32.totalorder %s203_s26, %s203_s26 }
  0xe7   :  { %v95_v63 = vrot.slane %v94_v62, 1  ;;  %p210_p13 = por %p209_p12, %p208_p11 }
  0xe9   :  { %v96_v1 = vadd.f32 %v95_v63, %v94_v62  ;;  %p211_p0 = pnand %p210_p13, %p204_p10 }
  0xeb   :  { %v100_v2 = vsel %vm99_vm1, %v96_v1, %v89_v0 }
  0xec   :  { %103 = vst.msk [vmem:[#allocation5] sm:$0x3] %vm102_vm3, %v100_v2 }
  0xed   :  { %214 = shalt.err (!%p211_p0)
}
  0xee   :  { %129 = dma.vmem_to_hbm [thread:$0]  %s127_s25, 32, %s274_s2, [#allocation4]  }
  0xef   :  { %225 = dma.done.wait [#allocation4], 32  }
  0xf0   :  { %226 = vsyncadd [#allocation4], 4294967264 }
  0xf1   :  { %227 = dma.done.wait [#allocation7], 32  }
  0xf2   :  { %228 = vsyncadd [#allocation7], 4294967264 }
  0xf3   :  { %146 = vsyncpa [#allocation3], 1 }
  0xf4   :  { %147 = vsyncpa [#allocation4], 1 }
  0xf5   :  { %148 = vsyncpa [#allocation7], 1 }

</bundles_post_ra>
